<compile_context>
chip_gen: v5e
topology: v5e:2x2
jax: 0.10.0
libtpu: 0.0.40
codegen_flags: <defaults>
</compile_context>

<pallas_src>
import functools

import jax
import jax.numpy as jnp
import numpy as np
from jax.experimental import pallas as pl
from jax.experimental.pallas import tpu as pltpu


def _mhgat_kernel(tok_ref, edge_ref, wtok_ref, wedge_ref, expand_ref,
                  wout_ref, bout_ref, out_ref, *, nhead, hidden, compute_dtype):
    """One grid step == one block of `Bt` batch elements, all heads fused."""
    Bt, L, Dt = tok_ref.shape
    NH = nhead * hidden
    cd = compute_dtype

    # --- fused fc + per-head attention(source) projection: ONE MXU pass ------
    tok2 = tok_ref[...].reshape(Bt * L, Dt).astype(cd)                 # (Bt*L, Dt)
    proj = jnp.dot(tok2, wtok_ref[...],
                   preferred_element_type=jnp.float32)                 # (Bt*L, NH+nhead)
    proj3 = proj.reshape(Bt, L, NH + nhead)
    h_tok = proj3[:, :, :NH]       # token part of per-head features   (Bt, L, NH)
    logits = proj3[:, :, NH:]      # per-head attention logits         (Bt, L, nhead)
    # (destination term, bias and the constant-over-j edge term cancel in the
    #  softmax over j, so they are never computed — see header note.)

    # --- per-head softmax over the sequence axis (same for every query row) --
    m = jnp.max(logits, axis=1, keepdims=True)
    p = jnp.exp(logits - m)
    attn = p / jnp.sum(p, axis=1, keepdims=True)                       # (Bt, L, nhead) f32

    # --- expand each head's weight across its hidden columns, weighted-sum ---
    attn_full = jnp.dot(attn.reshape(Bt * L, nhead), expand_ref[...],
                        preferred_element_type=jnp.float32)            # (Bt*L, NH)
    hp = jnp.sum(attn_full.reshape(Bt, L, NH) * h_tok, axis=1)         # (Bt, NH)

    # --- averaged-edge contribution: sum_j attn_j == 1, so it adds directly --
    avg_e = jnp.mean(edge_ref[...], axis=1).astype(cd)                 # (Bt, De)
    hp = hp + jnp.dot(avg_e, wedge_ref[...],
                      preferred_element_type=jnp.float32)              # (Bt, NH)

    # --- output projection, pre-replicated L times -> lane-dense store -------
    out = jnp.dot(hp.astype(cd), wout_ref[...],
                  preferred_element_type=jnp.float32) + bout_ref[...]  # (Bt, L*O)
    out_ref[...] = out.astype(out_ref.dtype)


def _detect_num_tensorcores():
    """Best-effort TensorCores-per-chip (v7x has 2); defaults to 1."""
    try:
        info = pltpu.get_tpu_info()
        for name in ("num_cores", "core_count", "num_tensorcores", "tensorcore_count"):
            v = getattr(info, name, None)
            if v:
                return max(1, int(v))
    except Exception:
        pass
    try:
        return max(1, int(getattr(jax.devices()[0], "num_cores", 1) or 1))
    except Exception:
        return 1


def multi_head_gat(token, edge, wfc, attnw, attnb, wout, bout,
                   *, block_b=None, compute_dtype=jnp.float32, num_cores=None):
    """token:(B,L,Dt) edge:(B,E,De) wfc:(nhead,H,Dt+De) attnw:(nhead,2H)
    attnb:(nhead,1) wout:(O,nhead*H) bout:(1,O)  ->  (B,L,O).

    `attnb` and the destination half of `attnw` are accepted for interface
    parity but are unused: they are constant along the softmax axis and cancel.
    """
    B, L, Dt = token.shape
    _, E, De = edge.shape
    nhead, H, Din = wfc.shape
    assert Din == Dt + De
    O = wout.shape[0]
    NH = nhead * H
    LO = L * O          # lane-dense output slab width (128 at the module's shapes)
    cd = jnp.dtype(compute_dtype)

    # ---- wrapper-side weight preprocessing (transpose / fold / cast once) ----
    wfc_t = jnp.transpose(wfc[:, :, :Dt], (2, 0, 1)).reshape(Dt, NH)     # (Dt, NH)
    wfc_e = jnp.transpose(wfc[:, :, Dt:], (2, 0, 1)).reshape(De, NH)     # (De, NH)
    eye = jnp.eye(nhead, dtype=jnp.float32)
    # block-diagonal source-attention weights, folded into the token fc weights
    w_att_src = jnp.einsum('nk,ng->nkg', attnw[:, :H], eye).reshape(NH, nhead)
    wtok_big = jnp.concatenate([wfc_t, wfc_t @ w_att_src], axis=1).astype(cd)  # (Dt, NH+nhead)
    wedge = wfc_e.astype(cd)                                             # (De, NH)
    expand = jnp.repeat(eye, H, axis=1)                                  # (nhead, NH) 0/1, f32
    # output weights replicated L times (all output rows are identical); keeps
    # the kernel store lane-dense.  Assumes modest L*O (128 here).
    wout_rep = jnp.tile(wout.T, (1, L)).astype(cd)                       # (NH, L*O)
    bout_rep = jnp.tile(bout.reshape(1, O), (1, L)).astype(jnp.float32)  # (1, L*O)

    # ---- batch-block size: fill MXU M dim, stay inside VMEM, pad B ----------
    tok_item = token.dtype.itemsize
    edg_item = edge.dtype.itemsize

    def _tile_bytes(bb):
        # double-buffered token / edge / output tiles for bb batch elements
        return 2 * bb * (L * Dt * tok_item + E * De * edg_item + LO * 4)

    weight_bytes = 2 * ((wtok_big.size + wedge.size + wout_rep.size) * cd.itemsize
                        + (expand.size + bout_rep.size) * 4)
    TILE_BUDGET = 32 << 20            # conservative vs v7x's 64 MiB per-core VMEM

    if num_cores is None:
        num_cores = _detect_num_tensorcores()

    if block_b is None:
        block_b = min(B, max(1, (256 + L - 1) // L))            # >= 256 matmul rows
        while block_b < B and _tile_bytes(min(2 * block_b, B)) <= TILE_BUDGET:
            block_b = min(2 * block_b, B)                        # fewest grid steps
        while num_cores > 1 and block_b > 1 and (B + block_b - 1) // block_b < num_cores:
            block_b = (block_b + 1) // 2                         # keep work for every core
    block_b = max(1, min(block_b, B))
    if block_b < B:
        block_b = ((block_b + 7) // 8) * 8                       # sublane-aligned out tile
        if block_b >= B:
            block_b = B
    grid_n = (B + block_b - 1) // block_b
    if num_cores > 1 and grid_n > 1 and grid_n % num_cores:
        grid_n = ((grid_n + num_cores - 1) // num_cores) * num_cores
    B_pad = grid_n * block_b

    if B_pad != B:
        token = jnp.concatenate(
            [token, jnp.zeros((B_pad - B, L, Dt), token.dtype)], axis=0)
        edge = jnp.concatenate(
            [edge, jnp.zeros((B_pad - B, E, De), edge.dtype)], axis=0)

    cp_kwargs = dict(dimension_semantics=("parallel",))
    vmem_need = _tile_bytes(block_b) + weight_bytes
    if vmem_need > (12 << 20):       # only override the scoped limit when needed
        cp_kwargs["vmem_limit_bytes"] = int(min(vmem_need + (8 << 20), 48 << 20))

    kernel = functools.partial(_mhgat_kernel, nhead=nhead, hidden=H,
                               compute_dtype=cd)

    out_slab = pl.pallas_call(
        kernel,
        out_shape=jax.ShapeDtypeStruct((B_pad, LO), jnp.float32),
        grid_spec=pltpu.PrefetchScalarGridSpec(
            num_scalar_prefetch=0,
            grid=(grid_n,),
            in_specs=[
                pl.BlockSpec((block_b, L, Dt), lambda b: (b, 0, 0)),   # token
                pl.BlockSpec((block_b, E, De), lambda b: (b, 0, 0)),   # edge
                pl.BlockSpec((Dt, NH + nhead), lambda b: (0, 0)),      # fc + attn(src), fused
                pl.BlockSpec((De, NH), lambda b: (0, 0)),              # fc (edge part)
                pl.BlockSpec((nhead, NH), lambda b: (0, 0)),           # head->hidden expansion
                pl.BlockSpec((NH, LO), lambda b: (0, 0)),              # out fc weight, L-replicated
                pl.BlockSpec((1, LO), lambda b: (0, 0)),               # out fc bias, L-replicated
            ],
            out_specs=pl.BlockSpec((block_b, LO), lambda b: (b, 0)),
        ),
        compiler_params=pltpu.CompilerParams(**cp_kwargs),
    )(token, edge, wtok_big, wedge, expand, wout_rep, bout_rep)

    return out_slab[:B].reshape(B, L, O)


def _reference(token, edge, wfc, attnw, attnb, wout, bout):
    """Pure-JAX transcription of the PyTorch forward, for verification."""
    B, L, _ = token.shape
    nhead, H, _ = wfc.shape
    avg_e = jnp.mean(edge, axis=1, keepdims=True)                      # (B,1,De)
    combined = jnp.concatenate(
        [token, jnp.broadcast_to(avg_e, (B, L, avg_e.shape[-1]))], axis=-1)
    outs = []
    for hd in range(nhead):
        h = combined @ wfc[hd].T                                       # (B,L,H)
        a = h @ attnw[hd, :H]                                          # column (j) term
        c = h @ attnw[hd, H:]                                          # row (i) term
        scores = c[:, :, None] + a[:, None, :] + attnb[hd, 0]          # (B,L,L)
        attn = jax.nn.softmax(scores, axis=-1)
        outs.append(jnp.einsum("bij,bjh->bih", attn, h))
    hp = jnp.concatenate(outs, axis=-1)
    return hp @ wout.T + bout[0]


if __name__ == "__main__":
    B, L, E = 2, 8, 6
    token_dim, edge_dim, hidden_dim = 16, 8, 32
    nhead, output_dim = 2, 16

    key = jax.random.PRNGKey(0)
    ks = jax.random.split(key, 7)
    token = jax.random.normal(ks[0], (B, L, token_dim), jnp.float32)
    edge = jax.random.normal(ks[1], (B, E, edge_dim), jnp.float32)

    # Deterministic synthetic parameters (shapes per module __init__)
    wfc = 0.1 * jax.random.normal(ks[2], (nhead, hidden_dim, token_dim + edge_dim), jnp.float32)
    attnw = 0.1 * jax.random.normal(ks[3], (nhead, 2 * hidden_dim), jnp.float32)
    attnb = 0.1 * jax.random.normal(ks[4], (nhead, 1), jnp.float32)
    wout = 0.1 * jax.random.normal(ks[5], (output_dim, nhead * hidden_dim), jnp.float32)
    bout = 0.1 * jax.random.normal(ks[6], (1, output_dim), jnp.float32)

    ref = _reference(token, edge, wfc, attnw, attnb, wout, bout)

    # f32 MXU-input path (default)
    out = multi_head_gat(token, edge, wfc, attnw, attnb, wout, bout)
    jax.block_until_ready(out)
    np.testing.assert_allclose(np.asarray(out), np.asarray(ref), rtol=2e-3, atol=2e-3)

    # bf16 MXU-input / f32-accumulate path (v6e/v7x), looser tolerance.
    out_bf16 = multi_head_gat(token, edge, wfc, attnw, attnb, wout, bout,
                              compute_dtype=jnp.bfloat16)
    jax.block_until_ready(out_bf16)
    np.testing.assert_allclose(np.asarray(out_bf16), np.asarray(ref), rtol=4e-2, atol=4e-2)

    print("KERNEL_OK")
</pallas_src>

<mosaic_0001>
module attributes {stable_mosaic.version = 11 : i64} {
  func.func @_mhgat_kernel(%arg0: i32, %arg1: memref<2x8x16xf32, #tpu.memory_space<vmem>>, %arg2: memref<2x6x8xf32, #tpu.memory_space<vmem>>, %arg3: memref<16x66xf32, #tpu.memory_space<vmem>>, %arg4: memref<8x64xf32, #tpu.memory_space<vmem>>, %arg5: memref<2x64xf32, #tpu.memory_space<vmem>>, %arg6: memref<64x128xf32, #tpu.memory_space<vmem>>, %arg7: memref<1x128xf32, #tpu.memory_space<vmem>>, %arg8: memref<2x128xf32, #tpu.memory_space<vmem>>) attributes {dimension_semantics = [#tpu.dimension_semantics<parallel>], iteration_bounds = array<i64: 1>, scalar_prefetch = 0 : i64, scratch_operands = 0 : i64, tpu.core_type = #tpu.core_type<tc>, window_params = [{transform_indices = @transform_0, window_bounds = array<i64: 2, 8, 16>}, {transform_indices = @transform_1, window_bounds = array<i64: 2, 6, 8>}, {pipeline_mode = #tpu.pipeline_mode<synchronous>, transform_indices = @transform_2, window_bounds = array<i64: 16, 66>}, {pipeline_mode = #tpu.pipeline_mode<synchronous>, transform_indices = @transform_3, window_bounds = array<i64: 8, 64>}, {pipeline_mode = #tpu.pipeline_mode<synchronous>, transform_indices = @transform_4, window_bounds = array<i64: 2, 64>}, {pipeline_mode = #tpu.pipeline_mode<synchronous>, transform_indices = @transform_5, window_bounds = array<i64: 64, 128>}, {pipeline_mode = #tpu.pipeline_mode<synchronous>, transform_indices = @transform_6, window_bounds = array<i64: 1, 128>}, {transform_indices = @transform_7, window_bounds = array<i64: 2, 128>}]} {
    %c0 = arith.constant 0 : index
    %c0_0 = arith.constant 0 : index
    %c0_1 = arith.constant 0 : index
    %0 = vector.load %arg1[%c0, %c0_0, %c0_1] : memref<2x8x16xf32, #tpu.memory_space<vmem>>, vector<2x8x16xf32>
    %1 = vector.shape_cast %0 : vector<2x8x16xf32> to vector<16x16xf32>
    %c0_2 = arith.constant 0 : index
    %c0_3 = arith.constant 0 : index
    %2 = vector.load %arg3[%c0_2, %c0_3] : memref<16x66xf32, #tpu.memory_space<vmem>>, vector<16x66xf32>
    %cst = arith.constant dense<0.000000e+00> : vector<16x66xf32>
    %3 = tpu.matmul %1, %2, %cst {dimension_numbers = #tpu.dot_dimension_numbers<[1], [0], [0], [1], [0, 0, 1, 1], [], []>} : vector<16x16xf32>, vector<16x66xf32>, vector<16x66xf32> -> vector<16x66xf32>
    %4 = vector.shape_cast %3 : vector<16x66xf32> to vector<2x8x66xf32>
    %5 = vector.extract_strided_slice %4 {offsets = [0, 0, 0], sizes = [2, 8, 64], strides = [1, 1, 1]} : vector<2x8x66xf32> to vector<2x8x64xf32>
    %6 = vector.extract_strided_slice %4 {offsets = [0, 0, 64], sizes = [2, 8, 2], strides = [1, 1, 1]} : vector<2x8x66xf32> to vector<2x8x2xf32>
    %cst_4 = arith.constant dense<0xFF800000> : vector<2x2xf32>
    %7 = vector.multi_reduction <maximumf>, %6, %cst_4 [1] : vector<2x8x2xf32> to vector<2x2xf32>
    %8 = vector.shape_cast %7 : vector<2x2xf32> to vector<2x1x2xf32>
    %9 = vector.broadcast %8 : vector<2x1x2xf32> to vector<2x8x2xf32>
    %10 = arith.subf %6, %9 : vector<2x8x2xf32>
    %11 = math.exp %10 : vector<2x8x2xf32>
    %cst_5 = arith.constant dense<0.000000e+00> : vector<2x2xf32>
    %12 = vector.multi_reduction <add>, %11, %cst_5 [1] : vector<2x8x2xf32> to vector<2x2xf32>
    %13 = vector.shape_cast %12 : vector<2x2xf32> to vector<2x1x2xf32>
    %14 = vector.broadcast %13 : vector<2x1x2xf32> to vector<2x8x2xf32>
    %15 = arith.divf %11, %14 : vector<2x8x2xf32>
    %16 = vector.shape_cast %15 : vector<2x8x2xf32> to vector<16x2xf32>
    %c0_6 = arith.constant 0 : index
    %c0_7 = arith.constant 0 : index
    %17 = vector.load %arg5[%c0_6, %c0_7] : memref<2x64xf32, #tpu.memory_space<vmem>>, vector<2x64xf32>
    %cst_8 = arith.constant dense<0.000000e+00> : vector<16x64xf32>
    %18 = tpu.matmul %16, %17, %cst_8 {dimension_numbers = #tpu.dot_dimension_numbers<[1], [0], [0], [1], [0, 0, 1, 1], [], []>} : vector<16x2xf32>, vector<2x64xf32>, vector<16x64xf32> -> vector<16x64xf32>
    %19 = vector.shape_cast %18 : vector<16x64xf32> to vector<2x8x64xf32>
    %20 = arith.mulf %19, %5 : vector<2x8x64xf32>
    %cst_9 = arith.constant dense<0.000000e+00> : vector<2x64xf32>
    %21 = vector.multi_reduction <add>, %20, %cst_9 [1] : vector<2x8x64xf32> to vector<2x64xf32>
    %c0_10 = arith.constant 0 : index
    %c0_11 = arith.constant 0 : index
    %c0_12 = arith.constant 0 : index
    %22 = vector.load %arg2[%c0_10, %c0_11, %c0_12] : memref<2x6x8xf32, #tpu.memory_space<vmem>>, vector<2x6x8xf32>
    %cst_13 = arith.constant dense<0.000000e+00> : vector<2x8xf32>
    %23 = vector.multi_reduction <add>, %22, %cst_13 [1] : vector<2x6x8xf32> to vector<2x8xf32>
    %cst_14 = arith.constant 6.000000e+00 : f32
    %24 = vector.broadcast %cst_14 : f32 to vector<2x8xf32>
    %25 = arith.divf %23, %24 : vector<2x8xf32>
    %c0_15 = arith.constant 0 : index
    %c0_16 = arith.constant 0 : index
    %26 = vector.load %arg4[%c0_15, %c0_16] : memref<8x64xf32, #tpu.memory_space<vmem>>, vector<8x64xf32>
    %cst_17 = arith.constant dense<0.000000e+00> : vector<2x64xf32>
    %27 = tpu.matmul %25, %26, %cst_17 {dimension_numbers = #tpu.dot_dimension_numbers<[1], [0], [0], [1], [0, 0, 1, 1], [], []>} : vector<2x8xf32>, vector<8x64xf32>, vector<2x64xf32> -> vector<2x64xf32>
    %28 = arith.addf %21, %27 : vector<2x64xf32>
    %c0_18 = arith.constant 0 : index
    %c0_19 = arith.constant 0 : index
    %29 = vector.load %arg6[%c0_18, %c0_19] : memref<64x128xf32, #tpu.memory_space<vmem>>, vector<64x128xf32>
    %cst_20 = arith.constant dense<0.000000e+00> : vector<2x128xf32>
    %30 = tpu.matmul %28, %29, %cst_20 {dimension_numbers = #tpu.dot_dimension_numbers<[1], [0], [0], [1], [0, 0, 1, 1], [], []>} : vector<2x64xf32>, vector<64x128xf32>, vector<2x128xf32> -> vector<2x128xf32>
    %c0_21 = arith.constant 0 : index
    %c0_22 = arith.constant 0 : index
    %31 = vector.load %arg7[%c0_21, %c0_22] : memref<1x128xf32, #tpu.memory_space<vmem>>, vector<1x128xf32>
    %32 = vector.broadcast %31 : vector<1x128xf32> to vector<2x128xf32>
    %33 = arith.addf %30, %32 : vector<2x128xf32>
    %c0_23 = arith.constant 0 : index
    %c0_24 = arith.constant 0 : index
    %34 = vector.load %arg8[%c0_23, %c0_24] : memref<2x128xf32, #tpu.memory_space<vmem>>, vector<2x128xf32>
    tpu.vector_store %arg8[%c0_23, %c0_24], %33 {strides = array<i32>} : memref<2x128xf32, #tpu.memory_space<vmem>>, vector<2x128xf32>,
    return
  }
  func.func @transform_0(%arg0: i32) -> (i32, i32, i32) {
    %c0_i32 = arith.constant 0 : i32
    %c0_i32_0 = arith.constant 0 : i32
    %c0_i32_1 = arith.constant 0 : i32
    return %arg0, %c0_i32, %c0_i32_0 : i32, i32, i32
  }
  func.func @transform_1(%arg0: i32) -> (i32, i32, i32) {
    %c0_i32 = arith.constant 0 : i32
    %c0_i32_0 = arith.constant 0 : i32
    %c0_i32_1 = arith.constant 0 : i32
    return %arg0, %c0_i32, %c0_i32_0 : i32, i32, i32
  }
  func.func @transform_2(%arg0: i32) -> (i32, i32) {
    %c0_i32 = arith.constant 0 : i32
    %c0_i32_0 = arith.constant 0 : i32
    %c0_i32_1 = arith.constant 0 : i32
    return %c0_i32, %c0_i32_0 : i32, i32
  }
  func.func @transform_3(%arg0: i32) -> (i32, i32) {
    %c0_i32 = arith.constant 0 : i32
    %c0_i32_0 = arith.constant 0 : i32
    %c0_i32_1 = arith.constant 0 : i32
    return %c0_i32, %c0_i32_0 : i32, i32
  }
  func.func @transform_4(%arg0: i32) -> (i32, i32) {
    %c0_i32 = arith.constant 0 : i32
    %c0_i32_0 = arith.constant 0 : i32
    %c0_i32_1 = arith.constant 0 : i32
    return %c0_i32, %c0_i32_0 : i32, i32
  }
  func.func @transform_5(%arg0: i32) -> (i32, i32) {
    %c0_i32 = arith.constant 0 : i32
    %c0_i32_0 = arith.constant 0 : i32
    %c0_i32_1 = arith.constant 0 : i32
    return %c0_i32, %c0_i32_0 : i32, i32
  }
  func.func @transform_6(%arg0: i32) -> (i32, i32) {
    %c0_i32 = arith.constant 0 : i32
    %c0_i32_0 = arith.constant 0 : i32
    %c0_i32_1 = arith.constant 0 : i32
    return %c0_i32, %c0_i32_0 : i32, i32
  }
  func.func @transform_7(%arg0: i32) -> (i32, i32) {
    %c0_i32 = arith.constant 0 : i32
    %c0_i32_0 = arith.constant 0 : i32
    return %arg0, %c0_i32 : i32, i32
  }
}

</mosaic_0001>

<bundles_post_ra>
// kernel: tpu_custom_call.1
= control target key start
LH: loop header
LB: loop body
LE: loop exit
PB: predicated region body
PF: predicated region fallthrough
CT: control target
= control target key end

     0   :  { %12 = vsyncpa [#allocation3], 0  ;;  %s530_s0 = inlined_call_operand.vmem [shape: f32[2,8,16], index: 0, kind: input, shape index: {}]   ;;  %s531_s1 = inlined_call_operand.vmem [shape: f32[2,6,8], index: 1, kind: input, shape index: {}]   ;;  %s532_s2 = inlined_call_operand.hbm [shape: f32[16,66], index: 2, kind: input, shape index: {}]   ;;  %s533_s3 = inlined_call_operand.vmem [shape: f32[8,64], index: 3, kind: input, shape index: {}]   ;;  %s534_s4 = inlined_call_operand.vmem [shape: f32[2,64], index: 4, kind: input, shape index: {}]   ;;  %s535_s5 = inlined_call_operand.hbm [shape: f32[64,128], index: 5, kind: input, shape index: {}]   ;;  %s536_s6 = inlined_call_operand.vmem [shape: f32[1,128], index: 6, kind: input, shape index: {}]   ;;  %s537_s7 = inlined_call_operand.hbm [shape: f32[2,128], index: 7, kind: output, shape index: {}]  }
   0x1   :  { %13 = vsyncpa [#allocation6], 0 }
   0x2   :  { %14 = vsyncpa [#allocation4], 0  ;;  %s23_s26 = sshll.u32 %s532_s2, 4  ;;  %s434_s27 = smov [#allocation2]   ;;  %s24_s26 = int_to_ptr.hbm [resolvable:$true] %s23_s26 }
   0x3   :  { %s25_s28 = sshll.u32 %s434_s27, 4  ;;  %s40_s8 = sshll.u32 %s535_s5, 4  ;;  %s26_s28 = int_to_ptr.vmem [resolvable:$true] %s25_s28  ;;  %s41_s8 = int_to_ptr.hbm [resolvable:$true] %s40_s8 }
   0x4   :  { %s435_s9 = smov 128   ;;  %s436_s10 = smov 8  }
   0x5   :  { %31 = dma.hbm_to_vmem [thread:$0]  %s24_s26, 256, %s26_s28, [#allocation3], %s435_s9, %s435_s9, %s436_s10  }
   0x6   :  { %s437_s11 = smov [#allocation5]  }
   0x7   :  { %s42_s12 = sshll.u32 %s437_s11, 4  ;;  %s43_s12 = int_to_ptr.vmem [resolvable:$true] %s42_s12 }
   0x8   :  { %48 = dma.hbm_to_vmem [thread:$0]  %s41_s8, 1024, %s43_s12, [#allocation6], %s435_s9, %s435_s9, %s436_s10  }
   0x9   :  { %428 = dma.done.wait [#allocation3], 256  }
   0xa   :  { %429 = vsyncadd [#allocation3], 4294967040 }
   0xb   :  { %430 = dma.done.wait [#allocation6], 1024  }
   0xc   :  { %431 = vsyncadd [#allocation6], 4294966272  ;;  %v62_v0 = vld [vmem:[#allocation2 + $0x8] sm:$0xff]  ;;  %v61_v1 = vld [vmem:[#allocation2] sm:$0xff]  ;;  %vm63_vm0 = vcmask 130048   ;;  %vm93_vm1 = vcmask 540160  }
   0xd   :  { %84 = vmatpush.msra.mxu0 %v62_v0  ;;  %v59_v2 = vld [vmem:[%s530_s0] sm:$0xff]  ;;  %v60_v3 = vld [vmem:[%s530_s0 + $0x8] sm:$0xff]  ;;  %vm170_vm2 = vcmask 1041408   ;;  %v439_v63 = vmov 6.0   ;;  %vm216_vm11 = vcmask 62464   ;;  %vm243_vm13 = vcmask 1041409  }
   0xe   :  { %v158_v32 = vld [vmem:[%s534_s4] sm:$0x3]  ;;  %s438_s4 = smov 64   ;;  %vm245_vm14 = vcmask 64512   ;;  %vm165_vm15 = vcmask 15360   ;;  %s440_s22 = smov [#allocation7]  }
   0xf   :  { %85 = vmatpush.msra.mxu0 %v61_v1  ;;  %333 = vmatpush.msk.msra.mxu1 %vm170_vm2, %v158_v32  ;;  %v214_v0 = vld [vmem:[%s531_s1] sm:$0x3f]  ;;  %v215_v1 = vld [vmem:[%s531_s1 + $0x8] sm:$0x3f]  ;;  %v279_v32 = vld [vmem:[#allocation5 + $0x28] sm:$0xff]  ;;  %s318_s23 = sshll.u32 %s440_s22, 4  ;;  %s319_s23 = int_to_ptr.vmem [resolvable:$true] %s318_s23 }
  0x10   :  { %331 = vmatmul.msk.f32.vlgmr.msra.gmra.mxu0 %vm63_vm0, %v59_v2  ;;  %v217_v2 = vsel %vm216_vm11, %v214_v0, 0.0  ;;  %s320_s26 = sshll.u32 %s537_s7, 4  ;;  %s321_s26 = int_to_ptr.hbm [resolvable:$true] %s320_s26 }
  0x18   :  { %332 = vmatmul.msk.f32.gmra.mxu0 %vm63_vm0, %v60_v3  ;;  %v224_v3 = vsel %vm216_vm11, %v215_v1, 0.0  ;;  %vm199_vm0 = vcmask 523264  }
  0x8d   :  { %v493_v4 = vpop.f32.mrf.mxu0 }
  0x8e   :  { %v94_v5 = vsel %vm93_vm1, %v493_v4, -inf }
  0x8f   :  { %v95_v6 = vrot.slane %v94_v5, 4 }
  0x91   :  { %v96_v7 = vmax.f32 %v94_v5, %v95_v6  ;;  %v218_v5 = vrot.slane %v217_v2, 4  ;;  %v225_v6 = vrot.slane %v224_v3, 4 }
  0x93   :  { %v97_v8 = vrot.slane %v96_v7, 2 }
  0x95   :  { %v98_v9 = vmax.f32 %v96_v7, %v97_v8  ;;  %v497_v10 = vpop.f32.mrf.mxu0  ;;  %v219_v8 = vadd.f32 %v218_v5, %v217_v2 }
  0x96   :  { %v101_v11 = vsel %vm93_vm1, %v497_v10, -inf }
  0x97   :  { %v99_v12 = vrot.slane %v98_v9, 1  ;;  %v102_v13 = vrot.slane %v101_v11, 4 }
  0x99   :  { %v100_v14 = vmax.f32 %v98_v9, %v99_v12  ;;  %v103_v15 = vmax.f32 %v101_v11, %v102_v13  ;;  %v226_v9 = vadd.f32 %v225_v6, %v224_v3  ;;  %v220_v12 = vrot.slane %v219_v8, 2 }
  0x9b   :  { %v108_v16 = vsub.f32 %v493_v4, %v100_v14  ;;  %v104_v17 = vrot.slane %v103_v15, 2  ;;  %v227_v13 = vrot.slane %v226_v9, 2 }
  0x9d   :  { %v110_v18 = vmul.f32 1.442695, %v108_v16  ;;  %v105_v19 = vmax.f32 %v103_v15, %v104_v17  ;;  %v221_v15 = vadd.f32 %v220_v12, %v219_v8  ;;  %v228_v16 = vadd.f32 %v227_v13, %v226_v9 }
  0x9f   :  { %346 = vpow2.f32 %v110_v18  ;;  %v106_v20 = vrot.slane %v105_v19, 1  ;;  %v222_v18 = vrot.slane %v221_v15, 1 }
  0xa1   :  { %v107_v21 = vmax.f32 %v105_v19, %v106_v20  ;;  %v229_v19 = vrot.slane %v228_v16, 1 }
  0xa3   :  { %v109_v22 = vsub.f32 %v497_v10, %v107_v21  ;;  %v223_v21 = vadd.f32 %v222_v18, %v221_v15 }
  0xa5   :  { %v347_v23 = vpop.eup %346  ;;  %v112_v24 = vmul.f32 1.442695, %v109_v22  ;;  %v230_v22 = vadd.f32 %v229_v19, %v228_v16 }
  0xa6   :  { %v114_v25 = vsel %vm93_vm1, %v347_v23, 0.0 }
  0xa7   :  { %v115_v26 = vrot.slane %v114_v25, 4  ;;  %348 = vpow2.f32 %v112_v24 }
  0xa9   :  { %v116_v27 = vadd.f32 %v115_v26, %v114_v25  ;;  %v240_v26 = vld [vmem:[%s533_s3] sm:$0xff] }
  0xaa   :  { %263 = vmatpush.msra.mxu2 %v240_v26 }
  0xab   :  { %v117_v28 = vrot.slane %v116_v27, 2 }
  0xad   :  { %v349_v29 = vpop.eup %348  ;;  %v118_v30 = vadd.f32 %v117_v28, %v116_v27 }
  0xae   :  { %v121_v31 = vsel %vm93_vm1, %v349_v29, 0.0 }
  0xaf   :  { %v119_v33 = vrot.slane %v118_v30, 1  ;;  %v122_v34 = vrot.slane %v121_v31, 4 }
  0xb1   :  { %v120_v35 = vadd.f32 %v119_v33, %v118_v30  ;;  %v123_v36 = vadd.f32 %v122_v34, %v121_v31  ;;  %v281_v30 = vld [vmem:[#allocation5 + $0x38] sm:$0xff]  ;;  %v280_v31 = vld [vmem:[#allocation5 + $0x30] sm:$0xff]  ;;  %v278_v33 = vld [vmem:[#allocation5 + $0x20] sm:$0xff] }
  0xb2   :  { %300 = vmatpush.msra.mxu3 %v281_v30  ;;  %v277_v34 = vld [vmem:[#allocation5 + $0x18] sm:$0xff] }
  0xb3   :  { %350 = vrcp.f32 %v120_v35  ;;  %v124_v37 = vrot.slane %v123_v36, 2  ;;  %v139_v44 = vand.u32 2147483648, %v120_v35  ;;  %v137_v46 = vand.u32 2147483647, %v120_v35 }
  0xb4   :  { %vm133_vm4 = vweird.f32 %v120_v35  ;;  %301 = vmatpush.msra.mxu3 %v280_v31 }
  0xb5   :  { %v125_v38 = vadd.f32 %v124_v37, %v123_v36  ;;  %v140_v49 = vor.u32 1.1754944e-38, %v139_v44  ;;  %vm138_vm6 = vcmp.eq.f32.partialorder %v137_v46, 8.507059e+37  ;;  %v275_v36 = vld [vmem:[#allocation5 + $0x8] sm:$0xff]  ;;  %v274_v37 = vld [vmem:[#allocation5] sm:$0xff] }
  0xb6   :  { %302 = vmatpush.msra.mxu3 %v279_v32 }
  0xb7   :  { %v126_v39 = vrot.slane %v125_v38, 1 }
  0xb8   :  { %303 = vmatpush.msra.mxu3 %v278_v33 }
  0xb9   :  { %v351_v40 = vpop.eup %350  ;;  %v127_v41 = vadd.f32 %v126_v39, %v125_v38 }
  0xba   :  { %v129_v42 = vmul.f32 %v351_v40, %v120_v35  ;;  %vm134_vm3 = vweird.f32 %v351_v40  ;;  %304 = vmatpush.msra.mxu3 %v277_v34  ;;  %v276_v35 = vld [vmem:[#allocation5 + $0x10] sm:$0xff] }
  0xbb   :  { %352 = vrcp.f32 %v127_v41  ;;  %vm135_vm5 = vmor %vm133_vm4, %vm134_vm3  ;;  %v154_v55 = vand.u32 2147483648, %v127_v41  ;;  %v152_v57 = vand.u32 2147483647, %v127_v41  ;;  %vm148_vm8 = vweird.f32 %v127_v41 }
  0xbc   :  { %v130_v43 = vsub.f32 1.0, %v129_v42  ;;  %354 = vrcp.f32 %v439_v63  ;;  %305 = vmatpush.msra.mxu3 %v276_v35 }
  0xbd   :  { %v155_v59 = vor.u32 1.1754944e-38, %v154_v55  ;;  %vm153_vm10 = vcmp.eq.f32.partialorder %v152_v57, 8.507059e+37 }
  0xbe   :  { %v131_v45 = vmul.f32 %v351_v40, %v130_v43  ;;  %306 = vmatpush.msra.mxu3 %v275_v36 }
  0xc0   :  { %v132_v47 = vadd.f32 %v351_v40, %v131_v45  ;;  %307 = vmatpush.msra.mxu3 %v274_v37 }
  0xc1   :  { %v353_v48 = vpop.eup %352 }
  0xc2   :  { %v136_v50 = vsel %vm135_vm5, %v351_v40, %v132_v47  ;;  %v144_v51 = vmul.f32 %v353_v48, %v127_v41  ;;  %vm149_vm7 = vweird.f32 %v353_v48  ;;  %v355_v7 = vpop.eup %354 }
  0xc3   :  { %v141_v52 = vsel %vm138_vm6, %v140_v49, %v136_v50  ;;  %vm150_vm9 = vmor %vm148_vm8, %vm149_vm7  ;;  %v232_v11 = vmul.f32 6.0, %v355_v7  ;;  %vm236_vm12 = vweird.f32 %v355_v7 }
  0xc4   :  { %v142_v53 = vmul.f32 %v347_v23, %v141_v52  ;;  %v145_v54 = vsub.f32 1.0, %v144_v51 }
  0xc5   :  { %v233_v14 = vsub.f32 1.0, %v232_v11 }
  0xc6   :  { %161 = vrot.lane.b32.xlu0 %v142_v53, %s438_s4  ;;  %v146_v56 = vmul.f32 %v353_v48, %v145_v54 }
  0xc7   :  { %v234_v17 = vmul.f32 %v355_v7, %v233_v14 }
  0xc8   :  { %v147_v58 = vadd.f32 %v353_v48, %v146_v56 }
  0xc9   :  { %v235_v20 = vadd.f32 %v355_v7, %v234_v17 }
  0xca   :  { %v151_v60 = vsel %vm150_vm9, %v353_v48, %v147_v58 }
  0xcb   :  { %v156_v61 = vsel %vm153_vm10, %v155_v59, %v151_v60  ;;  %v237_v23 = vsel %vm236_vm12, %v355_v7, %v235_v20 }
  0xcc   :  { %v157_v62 = vmul.f32 %v349_v29, %v156_v61  ;;  %v238_v24 = vmul.f32 %v237_v23, %v223_v21  ;;  %v239_v25 = vmul.f32 %v237_v23, %v230_v22 }
  0xce   :  { %163 = vrot.lane.b32.xlu0 %v157_v62, %s438_s4  ;;  %v244_v27 = vsel %vm243_vm13, %v239_v25, %v238_v24 }
  0xcf   :  { %336 = vmatmul.msk.f32.vlgmr.msra.gmra.mxu2 %vm245_vm14, %v244_v27 }
 0x138   :  { %v162_v28 = vpop.permute.xlu0 %161 }
 0x139   :  { %334 = vmatmul.msk.f32.vlgmr.msra.gmra.mxu1 %vm165_vm15, %v162_v28 }
 0x140   :  { %v164_v29 = vpop.permute.xlu0 %163 }
 0x141   :  { %335 = vmatmul.msk.f32.gmra.mxu1 %vm165_vm15, %v164_v29 }
 0x152   :  { %v265_v53 = vpop.f32.mrf.mxu2 }
 0x153   :  { %v269_v55 = vrot.slane %v265_v53, 1 }
 0x1b6   :  { %v191_v38 = vpop.f32.mrf.mxu1 }
 0x1b7   :  { %v197_v39 = vmul.f32 %v191_v38, %v493_v4 }
 0x1b9   :  { %v200_v40 = vsel %vm199_vm0, %v197_v39, 0.0 }
 0x1ba   :  { %v201_v41 = vrot.slane %v200_v40, 4 }
 0x1bc   :  { %v202_v42 = vadd.f32 %v201_v41, %v200_v40 }
 0x1be   :  { %v194_v43 = vpop.f32.mrf.mxu1  ;;  %v203_v45 = vrot.slane %v202_v42, 2 }
 0x1bf   :  { %v198_v44 = vmul.f32 %v194_v43, %v497_v10  ;;  %v345_v10 = vld [vmem:[%s536_s6] ss:$0 sm:$0xff] }
 0x1c0   :  { %v204_v48 = vadd.f32 %v203_v45, %v202_v42 }
 0x1c1   :  { %v207_v46 = vsel %vm199_vm0, %v198_v44, 0.0 }
 0x1c2   :  { %v208_v47 = vrot.slane %v207_v46, 4  ;;  %v205_v51 = vrot.slane %v204_v48, 1 }
 0x1c4   :  { %v209_v49 = vadd.f32 %v208_v47, %v207_v46  ;;  %v206_v4 = vadd.f32 %v205_v51, %v204_v48 }
 0x1c6   :  { %v210_v50 = vrot.slane %v209_v49, 2  ;;  %v272_v58 = vadd.f32 %v265_v53, %v206_v4 }
 0x1c8   :  { %v211_v52 = vadd.f32 %v210_v50, %v209_v49 }
 0x1ca   :  { %v212_v54 = vrot.slane %v211_v52, 1 }
 0x1cc   :  { %v213_v56 = vadd.f32 %v212_v54, %v211_v52 }
 0x1ce   :  { %v273_v57 = vadd.f32 %v269_v55, %v213_v56 }
 0x1d0   :  { %v288_v59 = vrot.slane %v273_v57, 7 }
 0x1d2   :  { %v289_v60 = vsel %vm243_vm13, %v288_v59, %v272_v58 }
 0x1d3   :  { %337 = vmatmul.msk.f32.vlgmr.msra.gmra.mxu3 %vm199_vm0, %v289_v60 }
 0x256   :  { %v309_v61 = vpop.f32.mrf.mxu3 }
 0x257   :  { %v310_v62 = vadd.f32 %v345_v10, %v309_v61 }
 0x259   :  { %312 = vst [vmem:[#allocation7] sm:$0x3] %v310_v62 }
 0x25a   :  { %323 = dma.vmem_to_hbm [thread:$0]  %s319_s23, 32, %s321_s26, [#allocation4]  }
 0x25b   :  { %432 = dma.done.wait [#allocation4], 32  }
 0x25c   :  { %433 = vsyncadd [#allocation4], 4294967264 }
 0x25d   :  { %328 = vsyncpa [#allocation3], 1 }
 0x25e   :  { %329 = vsyncpa [#allocation6], 1 }
 0x25f   :  { %330 = vsyncpa [#allocation4], 1 }

</bundles_post_ra>
